<compile_context>
chip_gen: v6e
topology: v6e:2x2x1
jax: 0.10.0
libtpu: 0.0.40
codegen_flags: <defaults>
</compile_context>

<pallas_src>
import jax
import jax.numpy as jnp
from jax.experimental import pallas as pl
from jax.experimental.pallas import tpu as pltpu


def _normalize_kernel(x_ref, mean_ref, inv_sd_ref, o_ref):
    # x_ref / o_ref: (b_blk, 1, rows_blk, 128) VMEM tile for channel c.
    # mean_ref / inv_sd_ref: full (C,) f32 vectors in SMEM (scalar-indexed).
    c = pl.program_id(2)
    m = mean_ref[c]
    inv = inv_sd_ref[c]
    xv = x_ref[...].astype(jnp.float32)          # compute in f32 regardless of input dtype
    o_ref[...] = ((xv - m) * inv).astype(o_ref.dtype)


def _vmem_params():
    """Generation-aware (block_budget_bytes, vmem_limit_bytes)."""
    phys = 128 * 1024 * 1024
    try:
        info = pltpu.get_tpu_info()
        phys = int(getattr(info, "vmem_capacity_bytes", phys))
    except Exception:
        phys = 64 * 1024 * 1024                  # conservative: assume smallest (v7x)
    if phys <= 64 * 1024 * 1024:                 # v7x: 64 MiB physical VMEM, 3.2 TB/s HBM
        budget = 6 * 1024 * 1024
    else:                                        # v5e / v6e: 128 MiB physical VMEM
        budget = 4 * 1024 * 1024
    # 32 MiB scoped limit is safe on all generations (<= physical everywhere)
    # and comfortably holds ~4x block of double-buffered in+out.
    return budget, 32 * 1024 * 1024


def _choose_tiles(batch, rows, lanes, itemsize, budget_bytes):
    """Pick (b_blk, rows_blk) so one block stays under budget_bytes.

    rows_blk is rounded to the dtype-aware sublane granule (8 for f32, 16 for
    bf16, 32 for int8/fp8) unless it covers the full row extent.  If even the
    minimum legal tile of the whole batch exceeds the budget, the batch is
    split across the grid (large-B VMEM guard).
    """
    sub = max(8, 32 // max(1, itemsize))         # sublane packing granule per dtype
    row_bytes = lanes * itemsize
    max_rows_full_b = budget_bytes // max(1, batch * row_bytes)
    if rows <= max_rows_full_b:
        return batch, rows                       # whole (B, R) slab of one channel fits
    if max_rows_full_b >= sub:
        return batch, (max_rows_full_b // sub) * sub
    # Large-batch guard: split B across the grid instead of blowing past VMEM.
    rows_blk = rows if rows < sub else sub
    b_blk = max(1, min(batch, budget_bytes // max(1, rows_blk * row_bytes)))
    return b_blk, rows_blk


def normalize_layer(x, means, sds):
    """Pallas equivalent of NormalizeLayer.forward.

    x:     (B, C, H, W) NCHW (same layout as the PyTorch module)
    means: (C,) per-channel means
    sds:   (C,) per-channel standard deviations
    returns (B, C, H, W), (x - mean[c]) / sd[c]
    """
    B, C, H, W = x.shape
    means_f32 = jnp.asarray(means, dtype=jnp.float32)
    inv_sds_f32 = 1.0 / jnp.asarray(sds, dtype=jnp.float32)   # divide -> multiply
    itemsize = jnp.dtype(x.dtype).itemsize

    S = H * W
    L = 128
    S_pad = ((S + L - 1) // L) * L
    R = S_pad // L
    x3 = x.reshape(B, C, S)
    if S_pad != S:
        # Pad to a lane-dense multiple of 128; one extra copy beats masked
        # partial stores on every tile (lane-utilization cliff for odd sizes).
        x3 = jnp.pad(x3, ((0, 0), (0, 0), (0, S_pad - S)))
    x4 = x3.reshape(B, C, R, L)

    budget, vmem_limit = _vmem_params()
    b_blk, rows_blk = _choose_tiles(B, R, L, itemsize, budget)

    # Row-tile axis first (typically the largest) for balanced megacore sharding.
    grid = (pl.cdiv(R, rows_blk), pl.cdiv(B, b_blk), C)
    block = (b_blk, 1, rows_blk, L)

    out4 = pl.pallas_call(
        _normalize_kernel,
        out_shape=jax.ShapeDtypeStruct((B, C, R, L), x.dtype),
        grid=grid,
        in_specs=[
            pl.BlockSpec(block, lambda r, b, c: (b, c, r, 0)),
            pl.BlockSpec(memory_space=pltpu.MemorySpace.SMEM),
            pl.BlockSpec(memory_space=pltpu.MemorySpace.SMEM),
        ],
        out_specs=pl.BlockSpec(block, lambda r, b, c: (b, c, r, 0)),
        compiler_params=pltpu.CompilerParams(
            dimension_semantics=("parallel", "parallel", "parallel"),
            vmem_limit_bytes=vmem_limit,
        ),
    )(x4, means_f32, inv_sds_f32)

    out = out4.reshape(B, C, S_pad)
    if S_pad != S:
        out = out[:, :, :S]
    return out.reshape(B, C, H, W)


if __name__ == "__main__":
    key = jax.random.PRNGKey(0)
    B, C, H, W = 2, 4, 16, 16

    x = jax.random.normal(key, (B, C, H, W), dtype=jnp.float32)
    # Deterministic "dataset statistics" (module __init__ takes per-channel means/sds).
    means = jnp.array([0.485, 0.456, 0.406, 0.5][:C], dtype=jnp.float32)
    sds = jnp.array([0.229, 0.224, 0.225, 0.25][:C], dtype=jnp.float32)

    out = normalize_layer(x, means, sds)
    out = jax.block_until_ready(out)

    # Reference check (same broadcasting semantics as the PyTorch forward).
    ref = (x - means[None, :, None, None]) / sds[None, :, None, None]
    assert out.shape == ref.shape
    assert jnp.allclose(out, ref, atol=1e-5, rtol=1e-5)

    # Also exercise the non-multiple-of-128 (padded) path for coverage.
    H2, W2 = 15, 13
    x2 = jax.random.normal(jax.random.PRNGKey(1), (B, C, H2, W2), dtype=jnp.float32)
    out2 = jax.block_until_ready(normalize_layer(x2, means, sds))
    ref2 = (x2 - means[None, :, None, None]) / sds[None, :, None, None]
    assert jnp.allclose(out2, ref2, atol=1e-5, rtol=1e-5)

    print("KERNEL_OK")
</pallas_src>

<mosaic_0001>
module attributes {stable_mosaic.version = 11 : i64} {
  func.func @_normalize_kernel(%arg0: i32, %arg1: i32, %arg2: i32, %arg3: memref<2x1x2x128xf32, #tpu.memory_space<vmem>>, %arg4: memref<4xf32, #tpu.memory_space<smem>>, %arg5: memref<4xf32, #tpu.memory_space<smem>>, %arg6: memref<2x1x2x128xf32, #tpu.memory_space<vmem>>) attributes {dimension_semantics = [#tpu.dimension_semantics<parallel>, #tpu.dimension_semantics<parallel>, #tpu.dimension_semantics<parallel>], iteration_bounds = array<i64: 1, 1, 4>, scalar_prefetch = 0 : i64, scratch_operands = 0 : i64, tpu.core_type = #tpu.core_type<tc>, window_params = [{transform_indices = @transform_0, window_bounds = array<i64: 2, 1, 2, 128>}, {transform_indices = @transform_1, window_bounds = array<i64: 4>}, {transform_indices = @transform_2, window_bounds = array<i64: 4>}, {transform_indices = @transform_3, window_bounds = array<i64: 2, 1, 2, 128>}]} {
    %0 = arith.index_cast %arg2 : i32 to index
    %1 = memref.load %arg4[%0] : memref<4xf32, #tpu.memory_space<smem>>
    %2 = arith.index_cast %arg2 : i32 to index
    %3 = memref.load %arg5[%2] : memref<4xf32, #tpu.memory_space<smem>>
    %c0 = arith.constant 0 : index
    %c0_0 = arith.constant 0 : index
    %c0_1 = arith.constant 0 : index
    %c0_2 = arith.constant 0 : index
    %4 = vector.load %arg3[%c0, %c0_0, %c0_1, %c0_2] : memref<2x1x2x128xf32, #tpu.memory_space<vmem>>, vector<2x1x2x128xf32>
    %5 = vector.broadcast %1 : f32 to vector<2x1x2x128xf32>
    %6 = arith.subf %4, %5 : vector<2x1x2x128xf32>
    %7 = vector.broadcast %3 : f32 to vector<2x1x2x128xf32>
    %8 = arith.mulf %6, %7 : vector<2x1x2x128xf32>
    %c0_3 = arith.constant 0 : index
    %c0_4 = arith.constant 0 : index
    %c0_5 = arith.constant 0 : index
    %c0_6 = arith.constant 0 : index
    %9 = vector.load %arg6[%c0_3, %c0_4, %c0_5, %c0_6] : memref<2x1x2x128xf32, #tpu.memory_space<vmem>>, vector<2x1x2x128xf32>
    tpu.vector_store %arg6[%c0_3, %c0_4, %c0_5, %c0_6], %8 {strides = array<i32>} : memref<2x1x2x128xf32, #tpu.memory_space<vmem>>, vector<2x1x2x128xf32>,
    return
  }
  func.func @transform_0(%arg0: i32, %arg1: i32, %arg2: i32) -> (i32, i32, i32, i32) {
    %c0_i32 = arith.constant 0 : i32
    %c0_i32_0 = arith.constant 0 : i32
    return %arg1, %arg2, %arg0, %c0_i32 : i32, i32, i32, i32
  }
  func.func @transform_1(%arg0: i32, %arg1: i32, %arg2: i32) -> i32 {
    %c0_i32 = arith.constant 0 : i32
    %c0_i32_0 = arith.constant 0 : i32
    return %c0_i32 : i32
  }
  func.func @transform_2(%arg0: i32, %arg1: i32, %arg2: i32) -> i32 {
    %c0_i32 = arith.constant 0 : i32
    %c0_i32_0 = arith.constant 0 : i32
    return %c0_i32 : i32
  }
  func.func @transform_3(%arg0: i32, %arg1: i32, %arg2: i32) -> (i32, i32, i32, i32) {
    %c0_i32 = arith.constant 0 : i32
    %c0_i32_0 = arith.constant 0 : i32
    return %arg1, %arg2, %arg0, %c0_i32 : i32, i32, i32, i32
  }
}

</mosaic_0001>

<bundles_post_ra>
// kernel: tpu_custom_call.1
= control target key start
LH: loop header
LB: loop body
LE: loop exit
PB: predicated region body
PF: predicated region fallthrough
CT: control target
= control target key end

     0   :  { %8 = vsyncpa [#allocation3], 0  ;;  %s862_s0 = inlined_call_operand.hbm [shape: f32[2,4,2,128], index: 0, kind: input, shape index: {}]   ;;  %s863_s1 = inlined_call_operand.vmem [shape: f32[4], index: 1, kind: input, shape index: {}]   ;;  %s864_s2 = inlined_call_operand.vmem [shape: f32[4], index: 2, kind: input, shape index: {}]   ;;  %s865_s3 = inlined_call_operand.hbm [shape: f32[2,4,2,128], index: 3, kind: output, shape index: {}]  }
   0x1   :  { %10 = vsyncpa [#allocation3 + $0x1], 0 }
   0x2   :  { %11 = vsyncpa [#allocation5], 0 }
   0x3   :  { %12 = vsyncpa [#allocation8], 0 }
   0x4   :  { %13 = vsyncpa [#allocation4], 0 }
   0x5   :  { %15 = vsyncpa [#allocation4 + $0x1], 0  ;;  %s673_s12 = smov 0   ;;  %s675_s13 = smov 0  }
   0x6   :  { %s677_s14 = smov 0   ;;  %s679_s15 = smov 0  }
   0x7   :  { %s681_s16 = smov 0   ;;  %s683_s17 = smov 0  }
   0x8 LB: > { %s389_s18 = sadd.s32 4294967295, %s641_s17   ;;  %s390_s19 = sadd.s32 4294967294, %s641_s17   ;;  %s641_s17 = sphi %s683_s17, %s21_s17   ;;  %s637_s16 = sphi %s681_s16, %s890_s16   ;;  %s633_s15 = sphi %s679_s15, %s889_s15   ;;  %s629_s14 = sphi %s677_s14, %s888_s14   ;;  %s625_s13 = sphi %s675_s13, %s887_s13   ;;  %s621_s12 = sphi %s673_s12, %s886_s12  }
   0x9   : > { %s51_s20 = sadd.s32 1, %s629_s14  ;;  %p58_p0 = scmp.ne.s32.totalorder %s629_s14, %s625_s13 }
   0xa   : > { %p59_p1 = scmp.eq.s32.totalorder %s641_s17, 0  ;;  %p64_p2 = scmp.ne.s32.totalorder %s625_s13, %s621_s12 }
   0xb   : > { %p711_p3 = scmp.eq.s32.totalorder %s389_s18, 0  ;;  %p134_p4 = scmp.eq.s32.totalorder %s389_s18, 3 }
   0xc   : > { %p715_p5 = por %p59_p1, %p58_p0  ;;  %p140_p6 = scmp.eq.s32.totalorder %s390_s19, 3 }
   0xd   : > { %s872_s21 = scalar_select %p711_p3, 1, 0 }
   0xe   : > { %p721_p7 = por %p711_p3, %p64_p2  ;;  %p725_p8 = por %p134_p4, %p58_p0 }
   0xf   : > { %p729_p9 = por %p140_p6, %p64_p2  ;;  %p391_p10 = scmp.ge.s32.totalorder %s641_s17, 1 }
  0x10   : > { %s874_s23 = scalar_select %p721_p7, 1, 0 }
  0x11   : > { %s875_s24 = scalar_select %p725_p8, 1, 0 }
  0x12   : > { %s876_s25 = scalar_select %p729_p9, 1, 0 }
  0x13   : > { %p147_p11 = scmp.lt.s32.totalorder %s641_s17, 5  ;;  %s160_s28 = sshll.u32 %s863_s1, 4  ;;  %s161_s28 = int_to_ptr.vmem [resolvable:$true] %s160_s28 }
  0x14   : > { %p435_p13 = scmp.lt.s32.totalorder %s641_s17, 4  ;;  %s171_s5 = sshll.u32 %s864_s2, 4  ;;  %s172_s5 = int_to_ptr.vmem [resolvable:$true] %s171_s5 }
  0x15   : > { %p738_p12 = pnand %p391_p10, %p147_p11  ;;  %s495_s8 = scalar_lea.vmem %s161_s28, 16 }
  0x16   : > { %p750_p1 = pnand %p435_p13, %p715_p5  ;;  %p496_p4 = scmp.ne.s32.totalorder %s161_s28, %s495_s8 }
  0x17   : > { %s877_s29 = scalar_select %p738_p12, 1, 0 }
  0x18   : > { %p418_p0 = pneg %p738_p12  ;;  %p503_p9 = scmp.lt.s32.totalorder %s161_s28, %s161_s28 }
  0x19   : > { %s878_s6 = scalar_select %p750_p1, 1, 0 }
  0x1a   : > { %p756_p2 = pnand %p418_p0, %p711_p3  ;;  %p504_p8 = scmp.lt.s32.totalorder %s495_s8, %s495_s8 }
  0x1c   : > { %p497_p6 = pneg %p756_p2  ;;  %p505_p7 = por %p504_p8, %p503_p9 }
  0x1e   : > { %p498_p10 = pnand %p497_p6, %p496_p4 }
  0x20   : > { %p499_p11 = pneg %p498_p10 }
  0x22   : > { %p506_p5 = pnand %p505_p7, %p499_p11 }
  0x24   : > { %509 = shalt.err (!%p506_p5)
}
  0x25   : > { %s643_s9 = smov [#allocation6]   ;;  %s510_s10 = scalar_lea.vmem %s172_s5, 16 }
  0x26   : > { %421 = dma.vmem_to_smem (!%p756_p2), %s161_s28, 16, %s643_s9, [#allocation5]  }
  0x27   : > { %p511_p13 = scmp.ne.s32.totalorder %s172_s5, %s510_s10  ;;  %p518_p12 = scmp.lt.s32.totalorder %s172_s5, %s172_s5 }
  0x28   : > { %p519_p1 = scmp.lt.s32.totalorder %s510_s10, %s510_s10 }
  0x29   : > { %p513_p0 = pnand %p511_p13, %p497_p6 }
  0x2a   : > { %p520_p4 = por %p519_p1, %p518_p12 }
  0x2b   : > { %p514_p3 = pneg %p513_p0 }
  0x2d   : > { %p521_p10 = pnand %p520_p4, %p514_p3 }
  0x2f   : > { %524 = shalt.err (!%p521_p10)
}
  0x30   : > { %s644_s11 = smov [#allocation7]   ;;  %s33_s18 = sadd.s32 1, %s637_s16 }
  0x31   : > { %424 = dma.vmem_to_smem (!%p756_p2), %s172_s5, 16, %s644_s11, [#allocation8]  }
  0x32   : > { %s182_s19 = sand.u32 1, %s629_s14   ;;  %p34_p7 = scmp.ge.s32.totalorder %s33_s18, 4 }
  0x33   : > { %s395_s22 = sshll.u32 %s182_s19, 2  ;;  %s396_s26 = sshll.u32 %s637_s16, 5 }
  0x34   : > { %s892_s18 = smov (%p34_p7, %s33_s18), 0  ;;  %s774_s30 = scalar_lea.hbm %s862_s0, %s396_s26 }
  0x35   : > { %s45_s4 = ssub.s32 %s637_s16, %s892_s18  ;;  %s186_s7 = scalar_lea.vmem [#allocation2], %s395_s22 }
  0x36   : > { %s196_s8 = sshll.u32 %s186_s7, 4  ;;  %p49_p3 = scmp.eq.s32.totalorder %s45_s4, 0  ;;  %s197_s8 = int_to_ptr.vmem [resolvable:$true] %s196_s8 }
  0x37   : > { %s183_s9 = scalar_lea.sflag [#allocation3], %s182_s19  ;;  %p880_p8 = scmp.ne.s32.totalorder %s878_s6, 0 }
  0x38   : > { %s781_s5 = scalar_select %p49_p3, %s629_s14, %s51_s20  }
  0x39   : > { %p527_p9 = pneg %p880_p8  ;;  %s538_s10 = scalar_lea.vmem %s197_s8, 64 }
  0x3a   : > { %p539_p12 = scmp.ne.s32.totalorder %s197_s8, %s538_s10  ;;  %s645_s11 = smov [#allocation2]  }
  0x3b   : > { %s543_s27 = sshll.u32 %s645_s11, 4  ;;  %s544_s27 = int_to_ptr.vmem [resolvable:$false] %s543_s27 }
  0x3c   : > { %p541_p1 = pnand %p539_p12, %p527_p9  ;;  %s545_s26 = scalar_lea.vmem %s544_s27, 128 }
  0x3d   : > { %p546_p6 = scmp.lt.s32.totalorder %s197_s8, %s544_s27  ;;  %p547_p11 = scmp.lt.s32.totalorder %s545_s26, %s538_s10 }
  0x3e   : > { %p542_p2 = pneg %p541_p1 }
  0x3f   : > { %p548_p5 = por %p547_p11, %p546_p6 }
  0x41   : > { %p549_p13 = pnand %p548_p5, %p542_p2 }
  0x43   : > { %552 = shalt.err (!%p549_p13)
}
  0x44   : > { %s646_s22 = smov 128   ;;  %s647_s20 = smov 32  }
  0x45   : > { %s648_s19 = smov 2   ;;  %p881_p0 = scmp.ne.s32.totalorder %s877_s29, 0 }
  0x46   : > { %428 = dma.hbm_to_vmem [thread:$0]  (!%p880_p8), %s774_s30, 64, %s197_s8, %s183_s9, %s646_s22, %s647_s20, %s648_s19  }
  0x47   : > { %208 = sbr.rel (%p881_p0) target bundleno = 112 (0x70), region = 32  ;;  %s791_s28 = sand.u32 (!%p881_p0), 1, %s625_s13  }
  0x48   : > { %s398_s4 = sshll.u32 (!%p881_p0), %s791_s28, 2  ;;  %s211_s7 = scalar_lea.sflag (!%p881_p0), [#allocation3], %s791_s28 }
  0x49   : > { %s214_s10 = scalar_lea.vmem (!%p881_p0), [#allocation2], %s398_s4  ;;  %p882_p4 = scmp.ne.s32.totalorder (!%p881_p0), %s874_s23, 0 }
  0x4c   : > { %604 = dma.done.wait (%p882_p4), %s211_s7, 64  }
  0x4d   : > { %606 = vsyncadd (%p882_p4), %s211_s7, 4294967232  ;;  %p883_p10 = scmp.ne.s32.totalorder %s872_s21, 0 }
  0x4f   : > { %608 = dma.done.wait (%p883_p10), [#allocation5], 16  }
  0x50   : > { %610 = vsyncadd (%p883_p10), [#allocation5], 4294967280 }
  0x51   : > { %612 = dma.done.wait (%p883_p10), [#allocation8], 16  }
  0x52   : > { %614 = vsyncadd (%p883_p10), [#allocation8], 4294967280 }
  0x53   : > { %227 = sfence }
  0x54   : > { %s248_s29 = sld [smem:[#allocation6 + %s633_s15]]  ;;  %v250_v0 = vld [vmem:[%s214_s10] sm:$0x3]  ;;  %s245_s23 = scalar_lea.vmem [#allocation9], %s398_s4  ;;  %v251_v1 = vld [vmem:[%s214_s10 + $0x2] sm:$0x3] }
  0x55   : > { %s249_s6 = sld [smem:[#allocation7 + %s633_s15]]  ;;  %s277_s30 = sshll.u32 %s245_s23, 4  ;;  %s810_s30 = int_to_ptr.vmem [resolvable:$true] %s277_s30 }
  0x56   : > { %s403_s8 = sshll.u32 %s633_s15, 5  ;;  %s261_s27 = scalar_lea.sflag [#allocation4], %s791_s28 }
  0x57   : > { %s815_s11 = scalar_lea.hbm %s865_s3, %s403_s8  ;;  %s553_s15 = scalar_lea.vmem %s810_s30, 64 }
  0x58   : > { %p554_p7 = scmp.ne.s32.totalorder %s810_s30, %s553_s15  ;;  %p884_p3 = scmp.ne.s32.totalorder %s875_s24, 0 }
  0x59   : > { %s649_s26 = smov [#allocation9]  }
  0x5a   : > { %v252_v2 = vstv %s248_s29  ;;  %p555_p8 = pnand %p554_p7, %p884_p3  ;;  %s557_s22 = sshll.u32 %s649_s26, 4  ;;  %s558_s22 = int_to_ptr.vmem [resolvable:$false] %s557_s22 }
  0x5b   : > { %v253_v3 = vsub.f32 %v250_v0, %v252_v2  ;;  %v255_v4 = vstv %s249_s6  ;;  %v254_v5 = vsub.f32 %v251_v1, %v252_v2  ;;  %s559_s20 = scalar_lea.vmem %s558_s22, 128  ;;  %p560_p12 = scmp.lt.s32.totalorder %s810_s30, %s558_s22 }
  0x5c   : > { %p556_p9 = pneg %p555_p8  ;;  %p561_p1 = scmp.lt.s32.totalorder %s559_s20, %s553_s15 }
  0x5d   : > { %v256_v6 = vmul.f32 %v255_v4, %v253_v3  ;;  %v257_v7 = vmul.f32 %v255_v4, %v254_v5 }
  0x5e   : > { %p562_p2 = por %p561_p1, %p560_p12 }
  0x5f   : > { %258 = vst [vmem:[%s245_s23] sm:$0x3] %v256_v6  ;;  %259 = vst [vmem:[%s245_s23 + $0x2] sm:$0x3] %v257_v7 }
  0x60   : > { %p563_p6 = pnand %p562_p2, %p556_p9 }
  0x62   : > { %566 = shalt.err (!%p563_p6)
}
  0x63   : > { %s567_s19 = scalar_lea.hbm %s815_s11, 64  ;;  %s571_s10 = scalar_lea.hbm %s865_s3, 256 }
  0x64   : > { %p568_p11 = scmp.ne.s32.totalorder %s815_s11, %s567_s19  ;;  %p572_p0 = scmp.lt.s32.totalorder %s815_s11, %s865_s3 }
  0x65   : > { %p573_p4 = scmp.lt.s32.totalorder %s571_s10, %s567_s19 }
  0x66   : > { %p569_p5 = pnand %p568_p11, %p884_p3 }
  0x67   : > { %p574_p10 = por %p573_p4, %p572_p0 }
  0x68   : > { %p570_p13 = pneg %p569_p5 }
  0x6a   : > { %p575_p7 = pnand %p574_p10, %p570_p13 }
  0x6c   : > { %578 = shalt.err (!%p575_p7)
}
  0x6d   : > { %s650_s23 = smov 32   ;;  %s651_s8 = smov 128  }
  0x6e   : > { %s652_s21 = smov 2  }
  0x6f   : > { %416 = dma.vmem_to_hbm [thread:$0]  (%p884_p3), %s810_s30, 64, %s815_s11, %s261_s27, %s650_s23, %s651_s8, %s652_s21  }
  0x70 PF: > { %p438_p8 = scmp.ge.s32.totalorder %s641_s17, 2  ;;  %s292_s9 = sand.u32 1, %s621_s12  }
  0x71   : > { %p885_p9 = scmp.ne.s32.totalorder %s876_s25, 0  ;;  %s293_s15 = scalar_lea.sflag [#allocation4], %s292_s9 }
  0x73   : > { %p430_p12 = pnand %p438_p8, %p885_p9 }
  0x75   : > { %p431_p1 = pneg %p430_p12 }
  0x77   : > { %616 = dma.done.wait (%p431_p1), %s293_s15, 64  }
  0x78   : > { %618 = vsyncadd (%p431_p1), %s293_s15, 4294967232  ;;  %s21_s17 = sadd.s32 1, %s641_s17   ;;  %s886_s12 = smov %s625_s13 }
  0x79   : > { %p18_p2 = scmp.ge.s32.totalorder %s21_s17, 6   ;;  %s887_s13 = smov %s629_s14 }
  0x7a   : > { %s888_s14 = smov %s781_s5  ;;  %s889_s15 = smov %s637_s16 }
  0x7b   : > { %s890_s16 = smov %s892_s18  ;;  %20 = sbr.rel (!%p18_p2) target bundleno = 8 (0x8), region = 86 }
  0x80   :  { %298 = vsyncpa [#allocation3], 1 }
  0x81   :  { %300 = vsyncpa [#allocation3 + $0x1], 1 }
  0x82   :  { %301 = vsyncpa [#allocation4], 1 }
  0x83   :  { %303 = vsyncpa [#allocation4 + $0x1], 1 }
  0x84   :  { %304 = vsyncpa [#allocation5], 1 }
  0x85   :  { %306 = vsyncpa [#allocation5 + $0x1], 1 }
  0x86   :  { %307 = vsyncpa [#allocation8], 1 }

</bundles_post_ra>
